<compile_context>
chip_gen: v5e
topology: v5e:2x2
jax: 0.10.0
libtpu: 0.0.40
codegen_flags: <defaults>
</compile_context>

<pallas_src>
import jax
import jax.numpy as jnp
from jax.experimental import pallas as pl
from jax.experimental.pallas import tpu as pltpu

_LANE_CHOICES = (1024, 512, 256, 128)


def _content_loss_kernel(x_ref, t_ref, acc_ref):
    """Accumulate per-lane sums of squared differences into the output block."""
    tile = pl.program_id(1)            # inner ("arbitrary") reduction axis

    @pl.when(tile == 0)
    def _init():
        acc_ref[...] = jnp.zeros_like(acc_ref)

    d = x_ref[...].astype(jnp.float32) - t_ref[...].astype(jnp.float32)
    sq = d * d
    r, lanes = sq.shape
    if r % 8 == 0:
        # Splitting the row (sublane) dim by 8 lands on vreg-tile boundaries,
        # so the reshape is a no-op relayout and the axis-0 reduce is pure VPU
        # vreg adds into the resident accumulator (no per-step XLU reduce).
        acc_ref[...] += jnp.sum(sq.reshape(r // 8, 8, lanes), axis=0)
    else:
        # Ragged row count: only reachable on the tiny single-tile path.
        r8 = (r // 8) * 8
        if r8 > 0:
            acc_ref[...] += jnp.sum(sq[:r8, :].reshape(r8 // 8, 8, lanes), axis=0)
        rem = jnp.sum(sq[r8:, :], axis=0, keepdims=True)            # (1, lanes)
        row = jax.lax.broadcasted_iota(jnp.int32, (8, lanes), 0)
        acc_ref[...] += jnp.where(row == 0,
                                  jnp.broadcast_to(rem, (8, lanes)),
                                  jnp.zeros((8, lanes), jnp.float32))


def _target_block_bytes():
    """Per-generation input-block size, gated on the chip's VMEM capacity."""
    vmem_cap = 64 * 1024 * 1024            # conservative default (v7x per-TC)
    try:
        info = pltpu.get_tpu_info()
        vmem_cap = int(getattr(info, "vmem_capacity_bytes", vmem_cap))
    except Exception:
        pass
    if vmem_cap >= 100 * 1024 * 1024:      # v5e / v6e: 128 MiB VMEM
        return 16 * 1024 * 1024
    return 8 * 1024 * 1024                 # v7x: 64 MiB VMEM per TensorCore


def content_loss_forward(x, target, *, tile_rows=None):
    """ContentLoss.forward: returns (x unchanged, mse_loss(x, target))."""
    assert x.shape == target.shape, "x and target must have identical shapes"
    n = x.size
    if n == 0:
        return x, jnp.float32(0.0)

    xf = x.reshape(-1)
    tf = target.reshape(-1)

    # ---- lane-dense 2-D view (free reshape of a contiguous buffer) ----------
    lanes = 0
    for cand in _LANE_CHOICES:             # prefer a row count that is a multiple of 8
        if n % (8 * cand) == 0:
            lanes = cand
            break
    if lanes == 0:
        for cand in _LANE_CHOICES:
            if n % cand == 0:
                lanes = cand
                break
    if lanes == 0:
        # Element count not a multiple of 128: a single fused XLA reduce is
        # already at the HBM roofline for this memory-bound op (no copies).
        d = xf.astype(jnp.float32) - tf.astype(jnp.float32)
        return x, jnp.sum(d * d) / jnp.float32(n)

    rows = n // lanes
    itemsize = jnp.dtype(x.dtype).itemsize

    if tile_rows is None:
        block_bytes = _target_block_bytes()
        tile_rows = max(32, (block_bytes // (lanes * itemsize)) // 32 * 32)
    else:
        assert tile_rows % 8 == 0, "tile_rows must be a multiple of 8"

    x2d = x.reshape(rows, lanes)           # bitcast, no copy
    t2d = target.reshape(rows, lanes)

    # Grid layout: (num_shards, tiles_per_shard).  The shard axis is "parallel"
    # (split across v7x's two TensorCores; iterates sequentially on 1-TC chips);
    # the tile axis is the sequential reduction.
    full_tiles = rows // tile_rows
    if full_tiles == 0:
        num_shards, tiles_per_shard, tr = 1, 1, rows       # block == full array dims
    elif full_tiles == 1:
        num_shards, tiles_per_shard, tr = 1, 1, tile_rows
    else:
        num_shards, tiles_per_shard, tr = 2, full_tiles // 2, tile_rows
    main_rows = num_shards * tiles_per_shard * tr
    main_elems = main_rows * lanes

    block_bytes_actual = tr * lanes * itemsize
    vmem_limit = max(32 * 1024 * 1024, 4 * block_bytes_actual + (8 << 20))

    grid_spec = pltpu.PrefetchScalarGridSpec(
        num_scalar_prefetch=0,
        grid=(num_shards, tiles_per_shard),
        in_specs=[
            pl.BlockSpec((tr, lanes), lambda c, i: (c * tiles_per_shard + i, 0)),
            pl.BlockSpec((tr, lanes), lambda c, i: (c * tiles_per_shard + i, 0)),
        ],
        # One resident (8, lanes) accumulator block per shard (output is the
        # accumulator; it stays in VMEM across the inner "arbitrary" axis).
        out_specs=pl.BlockSpec((8, lanes), lambda c, i: (c, 0)),
    )

    cost = pl.CostEstimate(
        flops=3 * main_elems,                               # sub + mul + add
        transcendentals=0,
        bytes_accessed=2 * main_elems * itemsize + num_shards * 8 * lanes * 4,
    )

    partial = pl.pallas_call(
        _content_loss_kernel,
        out_shape=jax.ShapeDtypeStruct((num_shards * 8, lanes), jnp.float32),
        grid_spec=grid_spec,
        compiler_params=pltpu.CompilerParams(
            dimension_semantics=("parallel", "arbitrary"),
            vmem_limit_bytes=vmem_limit,
        ),
        cost_estimate=cost,
    )(x2d, t2d)

    total = jnp.sum(partial)

    # Rows the tiled grid does not cover (< 2 * tile_rows of them): a fused XLA
    # slice+reduce reads them straight from the original buffers.
    if main_rows < rows:
        dt = x2d[main_rows:].astype(jnp.float32) - t2d[main_rows:].astype(jnp.float32)
        total = total + jnp.sum(dt * dt)

    # The module returns its input unchanged; no kernel passthrough needed.
    return x, total / jnp.float32(n)


if __name__ == "__main__":
    key = jax.random.PRNGKey(0)

    def _check(shape, *, tile_rows=None, seed_offset=0):
        kx, kt = jax.random.split(jax.random.fold_in(key, seed_offset))
        xx = jax.random.normal(kx, shape, dtype=jnp.float32)
        tt = jax.random.normal(kt, shape, dtype=jnp.float32)
        yy, loss = content_loss_forward(xx, tt, tile_rows=tile_rows)
        jax.block_until_ready((yy, loss))
        ref = jnp.mean((xx - tt) ** 2)
        assert bool(jnp.allclose(yy, xx)), "passthrough mismatch"
        assert bool(jnp.allclose(loss, ref, rtol=1e-5, atol=1e-6)), (shape, loss, ref)

    # Main demo: NCHW activation, single-tile kernel path.
    _check((2, 4, 16, 16), seed_offset=0)
    # Multi-tile, 2-shard ("parallel") path with a leftover-row jnp tail.
    _check((2, 9, 64, 64), tile_rows=32, seed_offset=1)
    # Ragged single-tile path (row count not a multiple of 8).
    _check((1, 2, 24, 24), seed_offset=2)
    # Element count not a multiple of 128 -> fused-XLA fallback path.
    _check((2, 3, 17, 19), seed_offset=3)

    print("KERNEL_OK")
</pallas_src>

<mosaic_0001>
module attributes {stable_mosaic.version = 11 : i64} {
  func.func @_content_loss_kernel(%arg0: i32, %arg1: i32, %arg2: memref<8x256xf32, #tpu.memory_space<vmem>>, %arg3: memref<8x256xf32, #tpu.memory_space<vmem>>, %arg4: memref<8x256xf32, #tpu.memory_space<vmem>>) attributes {dimension_semantics = [#tpu.dimension_semantics<parallel>, #tpu.dimension_semantics<arbitrary>], iteration_bounds = array<i64: 1, 1>, scalar_prefetch = 0 : i64, scratch_operands = 0 : i64, tpu.core_type = #tpu.core_type<tc>, window_params = [{transform_indices = @transform_0, window_bounds = array<i64: 8, 256>}, {transform_indices = @transform_1, window_bounds = array<i64: 8, 256>}, {transform_indices = @transform_2, window_bounds = array<i64: 8, 256>}]} {
    %c0_i32 = arith.constant 0 : i32
    %0 = arith.cmpi eq, %arg1, %c0_i32 : i32
    %1 = arith.extui %0 : i1 to i32
    %c0_i32_0 = arith.constant 0 : i32
    %2 = arith.cmpi ne, %1, %c0_i32_0 : i32
    scf.if %2 {
      %cst_8 = arith.constant 0.000000e+00 : f32
      %12 = vector.broadcast %cst_8 : f32 to vector<8x256xf32>
      %c0_9 = arith.constant 0 : index
      %c0_10 = arith.constant 0 : index
      %13 = vector.load %arg4[%c0_9, %c0_10] : memref<8x256xf32, #tpu.memory_space<vmem>>, vector<8x256xf32>
      tpu.vector_store %arg4[%c0_9, %c0_10], %12 {strides = array<i32>} : memref<8x256xf32, #tpu.memory_space<vmem>>, vector<8x256xf32>,
    } else {
    }
    %c0 = arith.constant 0 : index
    %c0_1 = arith.constant 0 : index
    %3 = vector.load %arg2[%c0, %c0_1] : memref<8x256xf32, #tpu.memory_space<vmem>>, vector<8x256xf32>
    %c0_2 = arith.constant 0 : index
    %c0_3 = arith.constant 0 : index
    %4 = vector.load %arg3[%c0_2, %c0_3] : memref<8x256xf32, #tpu.memory_space<vmem>>, vector<8x256xf32>
    %5 = arith.subf %3, %4 : vector<8x256xf32>
    %6 = arith.mulf %5, %5 : vector<8x256xf32>
    %c0_4 = arith.constant 0 : index
    %c0_5 = arith.constant 0 : index
    %7 = vector.load %arg4[%c0_4, %c0_5] : memref<8x256xf32, #tpu.memory_space<vmem>>, vector<8x256xf32>
    %8 = vector.shape_cast %6 : vector<8x256xf32> to vector<1x8x256xf32>
    %cst = arith.constant dense<0.000000e+00> : vector<8x256xf32>
    %9 = vector.multi_reduction <add>, %8, %cst [0] : vector<1x8x256xf32> to vector<8x256xf32>
    %10 = arith.addf %7, %9 : vector<8x256xf32>
    %c0_6 = arith.constant 0 : index
    %c0_7 = arith.constant 0 : index
    %11 = vector.load %arg4[%c0_6, %c0_7] : memref<8x256xf32, #tpu.memory_space<vmem>>, vector<8x256xf32>
    tpu.vector_store %arg4[%c0_6, %c0_7], %10 {strides = array<i32>} : memref<8x256xf32, #tpu.memory_space<vmem>>, vector<8x256xf32>,
    return
  }
  func.func @transform_0(%arg0: i32, %arg1: i32) -> (i32, i32) {
    %c1_i32 = arith.constant 1 : i32
    %0 = arith.muli %arg0, %c1_i32 : i32
    %1 = arith.addi %0, %arg1 : i32
    %c0_i32 = arith.constant 0 : i32
    %c0_i32_0 = arith.constant 0 : i32
    return %1, %c0_i32 : i32, i32
  }
  func.func @transform_1(%arg0: i32, %arg1: i32) -> (i32, i32) {
    %c1_i32 = arith.constant 1 : i32
    %0 = arith.muli %arg0, %c1_i32 : i32
    %1 = arith.addi %0, %arg1 : i32
    %c0_i32 = arith.constant 0 : i32
    %c0_i32_0 = arith.constant 0 : i32
    return %1, %c0_i32 : i32, i32
  }
  func.func @transform_2(%arg0: i32, %arg1: i32) -> (i32, i32) {
    %c0_i32 = arith.constant 0 : i32
    %c0_i32_0 = arith.constant 0 : i32
    return %arg0, %c0_i32 : i32, i32
  }
}

</mosaic_0001>

<bundles_post_ra>
// kernel: tpu_custom_call.1
= control target key start
LH: loop header
LB: loop body
LE: loop exit
PB: predicated region body
PF: predicated region fallthrough
CT: control target
= control target key end

     0   :  { %7 = vsyncpa [#allocation3], 0  ;;  %s199_s0 = inlined_call_operand.hbm [shape: f32[8,256], index: 0, kind: input, shape index: {}]   ;;  %s200_s1 = inlined_call_operand.hbm [shape: f32[8,256], index: 1, kind: input, shape index: {}]   ;;  %s201_s2 = inlined_call_operand.hbm [shape: f32[8,256], index: 2, kind: output, shape index: {}]  }
   0x1   :  { %8 = vsyncpa [#allocation6], 0 }
   0x2   :  { %9 = vsyncpa [#allocation4], 0  ;;  %s19_s11 = sshll.u32 %s199_s0, 4  ;;  %s172_s12 = smov [#allocation2]   ;;  %s20_s11 = int_to_ptr.hbm [resolvable:$true] %s19_s11 }
   0x3   :  { %s21_s13 = sshll.u32 %s172_s12, 4  ;;  %s34_s16 = sshll.u32 %s200_s1, 4  ;;  %s22_s13 = int_to_ptr.vmem [resolvable:$true] %s21_s13  ;;  %s35_s16 = int_to_ptr.hbm [resolvable:$true] %s34_s16 }
   0x4   :  { %24 = dma.hbm_to_vmem [thread:$0]  %s20_s11, 256, %s22_s13, [#allocation3]  }
   0x5   :  { %s173_s17 = smov [#allocation5]  }
   0x6   :  { %s36_s18 = sshll.u32 %s173_s17, 4  ;;  %s37_s18 = int_to_ptr.vmem [resolvable:$true] %s36_s18 }
   0x7   :  { %39 = dma.hbm_to_vmem [thread:$0]  %s35_s16, 256, %s37_s18, [#allocation6]  }
   0x8   :  { %166 = dma.done.wait [#allocation3], 256  }
   0x9   :  { %167 = vsyncadd [#allocation3], 4294967040 }
   0xa   :  { %168 = dma.done.wait [#allocation6], 256  }
   0xb   :  { %169 = vsyncadd [#allocation6], 4294967040  ;;  %v56_v0 = vld [vmem:[#allocation2] sm:$0xff]  ;;  %v58_v1 = vld [vmem:[#allocation5] sm:$0xff]  ;;  %s174_s0 = smov [#allocation7]   ;;  %s79_s21 = sshll.u32 %s201_s2, 4  ;;  %s80_s21 = int_to_ptr.hbm [resolvable:$true] %s79_s21 }
   0xc   :  { %v57_v2 = vld [vmem:[#allocation2 + $0x8] sm:$0xff]  ;;  %v60_v3 = vsub.f32 %v56_v0, %v58_v1  ;;  %v59_v4 = vld [vmem:[#allocation5 + $0x8] sm:$0xff]  ;;  %s77_s19 = sshll.u32 %s174_s0, 4  ;;  %s78_s19 = int_to_ptr.vmem [resolvable:$true] %s77_s19 }
   0xd   :  { %v61_v5 = vsub.f32 %v57_v2, %v59_v4 }
   0xe   :  { %v62_v6 = vmul.f32 %v60_v3, %v60_v3 }
   0xf   :  { %v63_v7 = vmul.f32 %v61_v5, %v61_v5 }
  0x10   :  { %70 = vst [vmem:[#allocation7] sm:$0xff] %v62_v6 }
  0x11   :  { %71 = vst [vmem:[#allocation7 + $0x8] sm:$0xff] %v63_v7 }
  0x12   :  { %82 = dma.vmem_to_hbm [thread:$0]  %s78_s19, 256, %s80_s21, [#allocation4]  }
  0x13   :  { %170 = dma.done.wait [#allocation4], 256  }
  0x14   :  { %171 = vsyncadd [#allocation4], 4294967040 }
  0x15   :  { %87 = vsyncpa [#allocation3], 1 }
  0x16   :  { %88 = vsyncpa [#allocation6], 1 }
  0x17   :  { %89 = vsyncpa [#allocation4], 1 }

</bundles_post_ra>
